<compile_context>
chip_gen: v7x
topology: tpu7x:2x2x1
jax: 0.10.0
libtpu: 0.0.40
codegen_flags: <defaults>
</compile_context>

<pallas_src>
import functools

import jax
import jax.numpy as jnp
from jax.experimental import pallas as pl
from jax.experimental.pallas import tpu as pltpu

NCORES = 2  # leading "parallel" grid axis; sharded across TensorCores on v7x


def center_loss_kernel(tag_ref, feat_ref, center_ref, sum0_ref, sum1_ref,
                       *, batch, block_b, steps_per_core):
    p = pl.program_id(0)   # core / batch-shard index ("parallel")
    i = pl.program_id(1)   # streaming step within the shard ("arbitrary")

    # Zero the per-core accumulators at the first step of each shard.
    @pl.when(i == 0)
    def _():
        sum0_ref[...] = jnp.zeros_like(sum0_ref)
        sum1_ref[...] = jnp.zeros_like(sum1_ref)

    tag = tag_ref[...]                                    # (tb, 1) int32
    feat = feat_ref[...].astype(jnp.float32)              # (tb, D)
    center = center_ref[...].astype(jnp.float32)          # (2, D), resident

    # c = center[tag]  -> VPU select (2 classes; no one-hot MXU gather).
    is_one = tag == 1                                     # (tb, 1) bool
    c = jnp.where(is_one, center[1:2, :], center[0:1, :])  # (tb, D)

    # d = ||feature - c||_2 per row (row reduce on XLU, sqrt on EUP).
    diff = feat - c
    d = jnp.sqrt(jnp.sum(diff * diff, axis=1, keepdims=True))   # (tb, 1)

    # Mask rows past the true batch (ragged last tile / clamped overflow steps).
    row0 = (p * steps_per_core + i) * block_b
    rows = row0 + jax.lax.broadcasted_iota(jnp.int32, (block_b, 1), 0)
    valid = rows < batch

    # Per-class partial sums of d: no divides, no per-step scalar reduce.
    sum0_ref[...] += jnp.where(valid & jnp.logical_not(is_one), d, 0.0)[jnp.newaxis]
    sum1_ref[...] += jnp.where(valid & is_one, d, 0.0)[jnp.newaxis]


def center_loss(tag, feature, center, *, block_b=1024):
    """tag: (B,) int in {0,1}, feature: (B, D), center: (2, D) -> scalar f32."""
    B, D = feature.shape
    C = center.shape[0]
    assert C == 2, "CenterLoss with histc(., 2) implies exactly two classes"

    tag2d = tag.astype(jnp.int32).reshape(B, 1)

    # histc(tag.float(), 2) for {0,1} labels == [B - sum(tag), sum(tag)].
    cnt1 = jnp.sum(tag.astype(jnp.int32)).astype(jnp.float32)
    cnt0 = jnp.float32(B) - cnt1

    # Tile size: capped at block_b, rounded to a multiple of 16 (bf16-safe
    # sublane packing; also satisfies f32/int32 tiling).  Ragged B is masked,
    # never handled by a full-batch fallback.
    mult = 16
    tb = min(block_b, B)
    tb = max(mult, (tb // mult) * mult)

    nblocks = pl.cdiv(B, tb)
    ncores = max(1, min(NCORES, nblocks))
    spc = pl.cdiv(nblocks, ncores)          # streaming steps per core

    def batch_map(p, i):
        # Clamp so overflow steps (p*spc + i >= nblocks) stay in-bounds;
        # their rows are masked to zero contribution inside the kernel.
        return (jnp.minimum(p * spc + i, nblocks - 1), 0)

    kernel = functools.partial(center_loss_kernel,
                               batch=B, block_b=tb, steps_per_core=spc)

    acc_spec = pl.BlockSpec((1, tb, 1), lambda p, i: (p, 0, 0))

    sum0, sum1 = pl.pallas_call(
        kernel,
        out_shape=(jax.ShapeDtypeStruct((ncores, tb, 1), jnp.float32),
                   jax.ShapeDtypeStruct((ncores, tb, 1), jnp.float32)),
        grid=(ncores, spc),
        in_specs=[
            pl.BlockSpec((tb, 1), batch_map),            # tag tile
            pl.BlockSpec((tb, D), batch_map),            # feature tile (pipelined)
            pl.BlockSpec((C, D), lambda p, i: (0, 0)),   # centers (resident)
        ],
        out_specs=(acc_spec, acc_spec),                  # per-core accumulators
        compiler_params=pltpu.CompilerParams(
            # Leading axis: batch shard per TensorCore (v7x); trailing axis is
            # the streaming/accumulation axis.
            dimension_semantics=("parallel", "arbitrary"),
            # Actual need is a few MiB (2 buffers x feature tile + residents);
            # 32 MiB is safe on v5e/v6e (128 MiB) and v7x (64 MiB).
            vmem_limit_bytes=32 * 1024 * 1024,
        ),
    )(tag2d, feature, center)

    # Tiny final reduction + the only two divides of the whole op
    # (per-class grouped sums: numerically cleaner than per-sample divides).
    return jnp.sum(sum0) / cnt0 + jnp.sum(sum1) / cnt1


def center_loss_ref(tag, feature, center):
    # Pure-JAX reference (same math as the PyTorch module for labels {0, 1}).
    c = center[tag]
    counts = jnp.bincount(tag, length=center.shape[0]).astype(jnp.float32)
    n = counts[tag]
    d = jnp.sqrt(((feature - c) ** 2).sum(1))
    return (d / n).sum()


if __name__ == "__main__":
    class_num = 2
    feature_dim = 32
    batch = 40        # not a multiple of the tile -> exercises ragged masking
    block_b = 16      # small tile so the demo exercises both grid axes

    key = jax.random.PRNGKey(0)
    k_center, k_feat, k_tag = jax.random.split(key, 3)

    # Deterministic init (the module's torch.tensor(class_num, feature_dim)
    # call is buggy; shape (class_num, feature_dim) is what it implies).
    center = jax.random.normal(k_center, (class_num, feature_dim), jnp.float32)
    feature = jax.random.normal(k_feat, (batch, feature_dim), jnp.float32)
    tag = jax.random.bernoulli(k_tag, 0.5, (batch,)).astype(jnp.int32)
    tag = tag.at[0].set(0).at[1].set(1)   # both classes present (histc assumption)

    # f32 path: matches the PyTorch forward numerics.
    loss = jax.block_until_ready(center_loss(tag, feature, center, block_b=block_b))
    loss_ref = center_loss_ref(tag, feature, center)
    assert jnp.allclose(loss, loss_ref, rtol=1e-5, atol=1e-5), (loss, loss_ref)

    # bf16 transport path: halves HBM traffic; compute/accumulation stay f32.
    feat_bf = feature.astype(jnp.bfloat16)
    cent_bf = center.astype(jnp.bfloat16)
    loss_bf = jax.block_until_ready(center_loss(tag, feat_bf, cent_bf, block_b=block_b))
    loss_bf_ref = center_loss_ref(tag, feat_bf.astype(jnp.float32),
                                  cent_bf.astype(jnp.float32))
    assert jnp.allclose(loss_bf, loss_bf_ref, rtol=1e-5, atol=1e-5), (loss_bf, loss_bf_ref)

    print("KERNEL_OK")
</pallas_src>

<mosaic_0001>
module attributes {stable_mosaic.version = 11 : i64} {
  func.func @center_loss_kernel(%arg0: i32, %arg1: i32, %arg2: memref<16x1xi32, #tpu.memory_space<vmem>>, %arg3: memref<16x32xf32, #tpu.memory_space<vmem>>, %arg4: memref<2x32xf32, #tpu.memory_space<vmem>>, %arg5: memref<1x16x1xf32, #tpu.memory_space<vmem>>, %arg6: memref<1x16x1xf32, #tpu.memory_space<vmem>>) attributes {dimension_semantics = [#tpu.dimension_semantics<parallel>, #tpu.dimension_semantics<arbitrary>], iteration_bounds = array<i64: 2, 2>, scalar_prefetch = 0 : i64, scratch_operands = 0 : i64, tpu.core_type = #tpu.core_type<tc>, window_params = [{transform_indices = @transform_0, window_bounds = array<i64: 16, 1>}, {transform_indices = @transform_1, window_bounds = array<i64: 16, 32>}, {pipeline_mode = #tpu.pipeline_mode<synchronous>, transform_indices = @transform_2, window_bounds = array<i64: 2, 32>}, {transform_indices = @transform_3, window_bounds = array<i64: 1, 16, 1>}, {transform_indices = @transform_4, window_bounds = array<i64: 1, 16, 1>}]} {
    %c0_i32 = arith.constant 0 : i32
    %0 = arith.cmpi eq, %arg1, %c0_i32 : i32
    %1 = arith.extui %0 : i1 to i32
    %c0_i32_0 = arith.constant 0 : i32
    %2 = arith.cmpi ne, %1, %c0_i32_0 : i32
    scf.if %2 {
      %cst_21 = arith.constant 0.000000e+00 : f32
      %45 = vector.broadcast %cst_21 : f32 to vector<1x16x1xf32>
      %c0_22 = arith.constant 0 : index
      %c0_23 = arith.constant 0 : index
      %c0_24 = arith.constant 0 : index
      %46 = vector.load %arg5[%c0_22, %c0_23, %c0_24] : memref<1x16x1xf32, #tpu.memory_space<vmem>>, vector<1x16x1xf32>
      tpu.vector_store %arg5[%c0_22, %c0_23, %c0_24], %45 {strides = array<i32>} : memref<1x16x1xf32, #tpu.memory_space<vmem>>, vector<1x16x1xf32>,
      %cst_25 = arith.constant 0.000000e+00 : f32
      %47 = vector.broadcast %cst_25 : f32 to vector<1x16x1xf32>
      %c0_26 = arith.constant 0 : index
      %c0_27 = arith.constant 0 : index
      %c0_28 = arith.constant 0 : index
      %48 = vector.load %arg6[%c0_26, %c0_27, %c0_28] : memref<1x16x1xf32, #tpu.memory_space<vmem>>, vector<1x16x1xf32>
      tpu.vector_store %arg6[%c0_26, %c0_27, %c0_28], %47 {strides = array<i32>} : memref<1x16x1xf32, #tpu.memory_space<vmem>>, vector<1x16x1xf32>,
    } else {
    }
    %c0 = arith.constant 0 : index
    %c0_1 = arith.constant 0 : index
    %3 = vector.load %arg2[%c0, %c0_1] : memref<16x1xi32, #tpu.memory_space<vmem>>, vector<16x1xi32>
    %c0_2 = arith.constant 0 : index
    %c0_3 = arith.constant 0 : index
    %4 = vector.load %arg3[%c0_2, %c0_3] : memref<16x32xf32, #tpu.memory_space<vmem>>, vector<16x32xf32>
    %c0_4 = arith.constant 0 : index
    %c0_5 = arith.constant 0 : index
    %5 = vector.load %arg4[%c0_4, %c0_5] : memref<2x32xf32, #tpu.memory_space<vmem>>, vector<2x32xf32>
    %c1_i32 = arith.constant 1 : i32
    %6 = vector.broadcast %c1_i32 : i32 to vector<16x1xi32>
    %7 = arith.cmpi eq, %3, %6 : vector<16x1xi32>
    %8 = vector.extract_strided_slice %5 {offsets = [1, 0], sizes = [1, 32], strides = [1, 1]} : vector<2x32xf32> to vector<1x32xf32>
    %9 = vector.extract_strided_slice %5 {offsets = [0, 0], sizes = [1, 32], strides = [1, 1]} : vector<2x32xf32> to vector<1x32xf32>
    %10 = vector.shape_cast %7 : vector<16x1xi1> to vector<16x1xi1>
    %11 = vector.broadcast %10 : vector<16x1xi1> to vector<16x32xi1>
    %12 = vector.shape_cast %8 : vector<1x32xf32> to vector<1x32xf32>
    %13 = vector.broadcast %12 : vector<1x32xf32> to vector<16x32xf32>
    %14 = vector.shape_cast %9 : vector<1x32xf32> to vector<1x32xf32>
    %15 = vector.broadcast %14 : vector<1x32xf32> to vector<16x32xf32>
    %16 = arith.select %11, %13, %15 : vector<16x32xi1>, vector<16x32xf32>
    %17 = arith.subf %4, %16 : vector<16x32xf32>
    %18 = arith.mulf %17, %17 : vector<16x32xf32>
    %cst = arith.constant dense<0.000000e+00> : vector<16xf32>
    %19 = vector.multi_reduction <add>, %18, %cst [1] : vector<16x32xf32> to vector<16xf32>
    %20 = vector.shape_cast %19 : vector<16xf32> to vector<16x1xf32>
    %21 = math.sqrt %20 : vector<16x1xf32>
    %c2_i32 = arith.constant 2 : i32
    %22 = arith.muli %arg0, %c2_i32 : i32
    %23 = arith.addi %22, %arg1 : i32
    %c16_i32 = arith.constant 16 : i32
    %24 = arith.muli %23, %c16_i32 : i32
    %25 = tpu.iota {dimensions = array<i32: 0>} : vector<16x1xi32>
    %26 = vector.broadcast %24 : i32 to vector<16x1xi32>
    %27 = arith.addi %26, %25 : vector<16x1xi32>
    %c40_i32 = arith.constant 40 : i32
    %28 = vector.broadcast %c40_i32 : i32 to vector<16x1xi32>
    %29 = arith.cmpi slt, %27, %28 : vector<16x1xi32>
    %c0_6 = arith.constant 0 : index
    %c0_7 = arith.constant 0 : index
    %c0_8 = arith.constant 0 : index
    %30 = vector.load %arg5[%c0_6, %c0_7, %c0_8] : memref<1x16x1xf32, #tpu.memory_space<vmem>>, vector<1x16x1xf32>
    %cst_9 = arith.constant dense<true> : vector<16x1xi1>
    %31 = arith.xori %7, %cst_9 : vector<16x1xi1>
    %32 = arith.andi %29, %31 : vector<16x1xi1>
    %cst_10 = arith.constant 0.000000e+00 : f32
    %33 = vector.broadcast %cst_10 : f32 to vector<16x1xf32>
    %34 = arith.select %32, %21, %33 : vector<16x1xi1>, vector<16x1xf32>
    %35 = vector.shape_cast %34 : vector<16x1xf32> to vector<1x16x1xf32>
    %36 = arith.addf %30, %35 : vector<1x16x1xf32>
    %c0_11 = arith.constant 0 : index
    %c0_12 = arith.constant 0 : index
    %c0_13 = arith.constant 0 : index
    %37 = vector.load %arg5[%c0_11, %c0_12, %c0_13] : memref<1x16x1xf32, #tpu.memory_space<vmem>>, vector<1x16x1xf32>
    tpu.vector_store %arg5[%c0_11, %c0_12, %c0_13], %36 {strides = array<i32>} : memref<1x16x1xf32, #tpu.memory_space<vmem>>, vector<1x16x1xf32>,
    %c0_14 = arith.constant 0 : index
    %c0_15 = arith.constant 0 : index
    %c0_16 = arith.constant 0 : index
    %38 = vector.load %arg6[%c0_14, %c0_15, %c0_16] : memref<1x16x1xf32, #tpu.memory_space<vmem>>, vector<1x16x1xf32>
    %39 = arith.andi %29, %7 : vector<16x1xi1>
    %cst_17 = arith.constant 0.000000e+00 : f32
    %40 = vector.broadcast %cst_17 : f32 to vector<16x1xf32>
    %41 = arith.select %39, %21, %40 : vector<16x1xi1>, vector<16x1xf32>
    %42 = vector.shape_cast %41 : vector<16x1xf32> to vector<1x16x1xf32>
    %43 = arith.addf %38, %42 : vector<1x16x1xf32>
    %c0_18 = arith.constant 0 : index
    %c0_19 = arith.constant 0 : index
    %c0_20 = arith.constant 0 : index
    %44 = vector.load %arg6[%c0_18, %c0_19, %c0_20] : memref<1x16x1xf32, #tpu.memory_space<vmem>>, vector<1x16x1xf32>
    tpu.vector_store %arg6[%c0_18, %c0_19, %c0_20], %43 {strides = array<i32>} : memref<1x16x1xf32, #tpu.memory_space<vmem>>, vector<1x16x1xf32>,
    return
  }
  func.func @transform_0(%arg0: i32, %arg1: i32) -> (i32, i32) {
    %c2_i32 = arith.constant 2 : i32
    %0 = arith.muli %arg0, %c2_i32 : i32
    %1 = arith.addi %0, %arg1 : i32
    %c2_i32_0 = arith.constant 2 : i32
    %2 = arith.minsi %1, %c2_i32_0 : i32
    %c0_i32 = arith.constant 0 : i32
    %c0_i32_1 = arith.constant 0 : i32
    return %2, %c0_i32 : i32, i32
  }
  func.func @transform_1(%arg0: i32, %arg1: i32) -> (i32, i32) {
    %c2_i32 = arith.constant 2 : i32
    %0 = arith.muli %arg0, %c2_i32 : i32
    %1 = arith.addi %0, %arg1 : i32
    %c2_i32_0 = arith.constant 2 : i32
    %2 = arith.minsi %1, %c2_i32_0 : i32
    %c0_i32 = arith.constant 0 : i32
    %c0_i32_1 = arith.constant 0 : i32
    return %2, %c0_i32 : i32, i32
  }
  func.func @transform_2(%arg0: i32, %arg1: i32) -> (i32, i32) {
    %c0_i32 = arith.constant 0 : i32
    %c0_i32_0 = arith.constant 0 : i32
    %c0_i32_1 = arith.constant 0 : i32
    return %c0_i32, %c0_i32_0 : i32, i32
  }
  func.func @transform_3(%arg0: i32, %arg1: i32) -> (i32, i32, i32) {
    %c0_i32 = arith.constant 0 : i32
    %c0_i32_0 = arith.constant 0 : i32
    %c0_i32_1 = arith.constant 0 : i32
    return %arg0, %c0_i32, %c0_i32_0 : i32, i32, i32
  }
  func.func @transform_4(%arg0: i32, %arg1: i32) -> (i32, i32, i32) {
    %c0_i32 = arith.constant 0 : i32
    %c0_i32_0 = arith.constant 0 : i32
    %c0_i32_1 = arith.constant 0 : i32
    return %arg0, %c0_i32, %c0_i32_0 : i32, i32, i32
  }
}

</mosaic_0001>

<bundles_post_ra>
// kernel: tpu_custom_call.1
= control target key start
LH: loop header
LB: loop body
LE: loop exit
PB: predicated region body
PF: predicated region fallthrough
CT: control target
= control target key end

     0   :  { %s691_s15 = smov 0   ;;  %s693_s16 = smov 0   ;;  %s814_s0 = inlined_call_operand.vmem [shape: s32[40,1], index: 0, kind: input, shape index: {}]   ;;  %s815_s1 = inlined_call_operand.vmem [shape: f32[40,32], index: 1, kind: input, shape index: {}]   ;;  %s816_s2 = inlined_call_operand.vmem [shape: f32[2,32], index: 2, kind: input, shape index: {}]   ;;  %s817_s3 = inlined_call_operand.vmem [shape: f32[2,16,1], index: 3, kind: output, shape index: {0}]   ;;  %s818_s4 = inlined_call_operand.vmem [shape: f32[2,16,1], index: 4, kind: output, shape index: {1}]  }
   0x1   :  { %s695_s17 = smov 0   ;;  %s697_s18 = smov 0  }
   0x2   :  { %s699_s19 = smov 0  }
   0x3 LB: > { %s24_s20 = sadd.s32 1, %s653_s17  ;;  %s27_s21 = sadd.s32 1, %s657_s18  ;;  %s661_s19 = sphi %s699_s19, %s15_s19   ;;  %s657_s18 = sphi %s697_s18, %s830_s18   ;;  %s653_s17 = sphi %s695_s17, %s829_s17   ;;  %s649_s16 = sphi %s693_s16, %s828_s16   ;;  %s645_s15 = sphi %s691_s15, %s827_s15  }
   0x4   : > { %p25_p0 = scmp.ge.s32.totalorder %s24_s20, 2  ;;  %p557_p1 = scmp.ge.s32.totalorder %s661_s19, 1 }
   0x5   : > { %p237_p2 = scmp.lt.s32.totalorder %s661_s19, 5 }
   0x6   : > { %s832_s20 = smov (%p25_p0, %s24_s20), 0  ;;  %s834_s21 = smov (!%p25_p0, %s27_s21), %s657_s18 }
   0x7   : > { %p238_p3 = pnand %p557_p1, %p237_p2  ;;  %p29_p4 = scmp.ge.s32.totalorder %s834_s21, 2 }
   0x8   : > { %s558_s22 = sshll.u32 (!%p238_p3), %s649_s16, 1  ;;  %p333_p5 = scmp.lt.s32.totalorder (!%p238_p3), %s649_s16, 1 }
   0x9   : > { %s836_s21 = smov (%p29_p4, %s834_s21), 0  ;;  %241 = sbr.rel (%p238_p3) target bundleno = 328 (0x148), region = 32 }
   0xa   : > { %s724_s23 = sadd.s32 (!%p238_p3), %s645_s15, %s558_s22  ;;  %p568_p8 = scmp.ne.s32.totalorder (!%p238_p3), %s645_s15, 0 }
   0xb   : > { %p291_p6 = scmp.lt.s32.totalorder (!%p238_p3), %s724_s23, 2 }
  0x10   : > { %s838_s16 = smov (!%p333_p5, %s649_s16), 1  ;;  %vm347_vm0 = vcmask (!%p568_p8), 7168   ;;  %v663_v0 = vmov (!%p568_p8), 0.0  }
  0x11   : > { %s292_s24 = scalar_select %p291_p6, %s724_s23, 2 }
  0x12   : > { %s573_s25 = sshll.u32 %s838_s16, 4  ;;  %346 = sbr.rel (%p568_p8) target bundleno = 25 (0x19), region = 36 }
  0x13   : > { %s559_s26 = sshll.u32 %s292_s24, 1  ;;  %s731_s29 = scalar_lea.vmem %s817_s3, %s573_s25 }
  0x14   : > { %p298_p7 = scmp.lt.s32.totalorder %s559_s26, 4  ;;  %s736_s6 = scalar_lea.vmem %s818_s4, %s573_s25  ;;  %348 = vst.msk [vmem:[%s731_s29] sm:$0xff] (!%p568_p8), %vm347_vm0, %v663_v0  ;;  %349 = vst.msk [vmem:[%s731_s29 + $0x8] sm:$0xff] (!%p568_p8), %vm347_vm0, %v663_v0 }
  0x15   : > { %350 = vst.msk [vmem:[%s736_s6] sm:$0xff] (!%p568_p8), %vm347_vm0, %v663_v0  ;;  %351 = vst.msk [vmem:[%s736_s6 + $0x8] sm:$0xff] (!%p568_p8), %vm347_vm0, %v663_v0 }
  0x16   : > { %s840_s26 = smov (!%p298_p7, %s559_s26), 4 }
  0x17   : > { %s560_s7 = sshll.u32 %s840_s26, 3 }
  0x18   : > { %s301_s10 = scalar_lea.vmem %s814_s0, %s560_s7  ;;  %s744_s13 = scalar_lea.vmem %s815_s1, %s560_s7 }
  0x19 PF: > { %v352_v1 = vld [vmem:[%s301_s10] sm:$0xff]  ;;  %v369_v2 = vlaneseq  ;;  %s570_s14 = sshll.u32 %s724_s23, 4  ;;  %v353_v3 = vld [vmem:[%s301_s10 + $0x8] sm:$0xff]  ;;  %v664_v4 = vmov 0   ;;  %vm665_vm3 = vmmov 1   ;;  %vm383_vm13 = vcmask 261120  }
  0x1a   : > { %618 = vset.pattern.permute.xlu0 %v664_v4  ;;  %vm357_vm1 = vcmp.eq.s32.totalorder %v352_v1, 1  ;;  %v410_v5 = vstv %s570_s14  ;;  %vm358_vm2 = vcmp.eq.s32.totalorder %v353_v3, 1  ;;  %v356_v18 = vld [vmem:[%s816_s2] sm:$0x3]  ;;  %v355_v26 = vld [vmem:[%s744_s13 + $0x8] sm:$0xff] }
  0x1b   : > { %v359_v6 = vsel %vm357_vm1, 1, %v664_v4  ;;  %v370_v7 = vshrl.u32 %v369_v2, 7  ;;  %vm417_vm4 = vmxor %vm357_vm1, %vm665_vm3  ;;  %v360_v9 = vsel %vm358_vm2, 1, %v664_v4  ;;  %v354_v22 = vld [vmem:[%s744_s13] sm:$0xff]  ;;  %v416_v49 = vld [vmem:[%s731_s29 + $0x8] sm:$0xff] }
  0x1c   : > { %362 = vperm.xlu0 %618, %v359_v6   ;;  %vm418_vm6 = vmxor %vm358_vm2, %vm665_vm3  ;;  %v415_v38 = vld [vmem:[%s731_s29] sm:$0xff]  ;;  %v429_v50 = vld [vmem:[%s736_s6 + $0x8] sm:$0xff] }
  0x1d   : > { %v411_v8 = vadd.s32 %v410_v5, %v370_v7  ;;  %v409_v10 = vadd.s32 8, %v370_v7  ;;  %v371_v16 = vsub.s32 1, %v370_v7  ;;  %v375_v17 = vsub.s32 0, %v370_v7  ;;  %v428_v39 = vld [vmem:[%s736_s6] sm:$0xff] }
  0x1f   : > { %vm413_vm5 = vcmp.lt.s32.totalorder %v411_v8, 40  ;;  %v412_v11 = vadd.s32 %v410_v5, %v409_v10  ;;  %v372_v19 = vrot.slane %v356_v18, %v371_v16  ;;  %v376_v20 = vrot.slane %v356_v18, %v375_v17 }
  0x20   : > { %vm756_vm7 = vmand %vm413_vm5, %vm417_vm4  ;;  %365 = vperm.xlu0 %618, %v360_v9  }
  0x21   : > { %vm761_vm8 = vmand %vm413_vm5, %vm357_vm1  ;;  %vm414_vm9 = vcmp.lt.s32.totalorder %v412_v11, 40  ;;  %vm425_vm1 = vcmask 7168  }
  0x22   : > { %vm765_vm10 = vmand %vm414_vm9, %vm418_vm6 }
  0x23   : > { %vm770_vm11 = vmand %vm414_vm9, %vm358_vm2 }
  0x9b   : > { %v363_v21 = vpop.permute.xlu0 %362 }
  0x9c   : > { %vm367_vm12 = vcmp.eq.s32.totalorder %v363_v21, 1 }
  0x9d   : > { %v377_v23 = vsel %vm367_vm12, %v372_v19, %v376_v20 }
  0x9e   : > { %v379_v24 = vsub.f32 %v354_v22, %v377_v23 }
  0x9f   : > { %v366_v25 = vpop.permute.xlu0 %365 }
  0xa0   : > { %vm368_vm14 = vcmp.eq.s32.totalorder %v366_v25, 1  ;;  %v381_v27 = vmul.f32 %v379_v24, %v379_v24 }
  0xa1   : > { %v378_v28 = vsel %vm368_vm14, %v372_v19, %v376_v20 }
  0xa2   : > { %v384_v29 = vsel %vm383_vm13, %v381_v27, 0.0  ;;  %v380_v30 = vsub.f32 %v355_v26, %v378_v28 }
  0xa3   : > { %385 = vadd.xlane.f32.xlu1 %v384_v29 }
  0xa4   : > { %v382_v31 = vmul.f32 %v380_v30, %v380_v30 }
  0xa6   : > { %v387_v32 = vsel %vm383_vm13, %v382_v31, 0.0 }
  0xa7   : > { %388 = vadd.xlane.f32.xlu1 %v387_v32 }
 0x130   : > { %v386_v33 = vpop.xlane.xlu1 %385 }
 0x131   : > { %619 = vrsqrt.f32 %v386_v33  ;;  %vm392_vm15 = vcmp.eq.f32.partialorder %v386_v33, inf  ;;  %v395_v37 = vand.u32 2147483648, %v386_v33  ;;  %vm394_vm0 = vcmp.eq.f32.partialorder %v386_v33, 0.0 }
 0x134   : > { %v389_v34 = vpop.xlane.xlu1 %388 }
 0x135   : > { %621 = vrsqrt.f32 %v389_v34  ;;  %vm399_vm2 = vcmp.eq.f32.partialorder %v389_v34, inf  ;;  %v402_v48 = vand.u32 2147483648, %v389_v34  ;;  %vm401_vm3 = vcmp.eq.f32.partialorder %v389_v34, 0.0 }
 0x13b   : > { %v620_v35 = vpop.eup %619 }
 0x13c   : > { %v391_v36 = vmul.f32 %v620_v35, %v386_v33 }
 0x13e   : > { %v393_v40 = vsel %vm392_vm15, %v386_v33, %v391_v36 }
 0x13f   : > { %v622_v41 = vpop.eup %621  ;;  %v396_v42 = vsel %vm394_vm0, %v395_v37, %v393_v40 }
 0x140   : > { %v421_v43 = vsel %vm756_vm7, %v396_v42, 0.0  ;;  %v432_v44 = vsel %vm761_vm8, %v396_v42, 0.0  ;;  %v398_v45 = vmul.f32 %v622_v41, %v389_v34 }
 0x141   : > { %v423_v46 = vadd.f32 %v421_v43, %v415_v38  ;;  %v434_v47 = vadd.f32 %v432_v44, %v428_v39 }
 0x142   : > { %v400_v51 = vsel %vm399_vm2, %v389_v34, %v398_v45 }
 0x143   : > { %426 = vst.msk [vmem:[%s731_s29] sm:$0xff] %vm425_vm1, %v423_v46  ;;  %436 = vst.msk [vmem:[%s736_s6] sm:$0xff] %vm425_vm1, %v434_v47  ;;  %v403_v52 = vsel %vm401_vm3, %v402_v48, %v400_v51 }
 0x144   : > { %v422_v53 = vsel %vm765_vm10, %v403_v52, 0.0  ;;  %v433_v54 = vsel %vm770_vm11, %v403_v52, 0.0 }
 0x145   : > { %v424_v55 = vadd.f32 %v422_v53, %v416_v49  ;;  %v435_v56 = vadd.f32 %v433_v54, %v429_v50 }
 0x147   : > { %427 = vst.msk [vmem:[%s731_s29 + $0x8] sm:$0xff] %vm425_vm1, %v424_v55  ;;  %437 = vst.msk [vmem:[%s736_s6 + $0x8] sm:$0xff] %vm425_vm1, %v435_v56 }
 0x148 PF: > { %s15_s19 = sadd.s32 1, %s661_s19   ;;  %s827_s15 = smov %s653_s17 }
 0x149   : > { %p12_p9 = scmp.ge.s32.totalorder %s15_s19, 6   ;;  %s828_s16 = smov %s657_s18 }
 0x14a   : > { %s829_s17 = smov %s832_s20  ;;  %s830_s18 = smov %s836_s21 }
 0x14b   :  { %14 = sbr.rel (!%p12_p9) target bundleno = 3 (0x3), region = 81 }

</bundles_post_ra>
